<compile_context>
chip_gen: v7x
topology: tpu7x:2x2x1
jax: 0.10.0
libtpu: 0.0.40
codegen_flags: <defaults>
</compile_context>

<pallas_src>
import functools

import numpy as np
import jax
import jax.numpy as jnp
from jax.experimental import pallas as pl
from jax.experimental.pallas import tpu as pltpu


def _round_up(x, m):
    return ((x + m - 1) // m) * m


def _gather_sigmoid_kernel(labels_ref, x_hbm, o_ref, buf, sems, *, block, n_total):
    """Per grid step: gather `block` (mask, class) rows from HBM, sigmoid, store.

    labels_ref: SMEM [N] int32 (scalar prefetch)
    x_hbm:      HBM  [N, C, HW] logits (no auto-DMA; manual gather below)
    o_ref:      VMEM [block, HW] output tile (lane-dense)
    buf:        VMEM [block, HW] gather scratch
    sems:       DMA semaphores, one per in-flight row copy
    """
    i = pl.program_id(0)
    base = i * block

    # Read all scalar indices up front (SMEM reads before any DMA wait).
    srcs = []
    for j in range(block):
        n = jnp.minimum(base + j, n_total - 1)  # clamp padded rows
        c = labels_ref[n]                       # class channel for mask n
        srcs.append((n, c))

    # Issue `block` concurrent contiguous row gathers HBM -> VMEM.
    for j, (n, c) in enumerate(srcs):
        pltpu.make_async_copy(x_hbm.at[n, c], buf.at[j], sems.at[j]).start()
    for j, (n, c) in enumerate(srcs):
        pltpu.make_async_copy(x_hbm.at[n, c], buf.at[j], sems.at[j]).wait()

    logits = buf[...].astype(jnp.float32)
    # sigmoid(x) = 1 / (1 + exp(-x)); exp and approx reciprocal both go to EUP.
    probs = pl.reciprocal(1.0 + jnp.exp(-logits), approx=True)
    o_ref[...] = probs.astype(o_ref.dtype)


def mask_post_process_probs(x, labels, *, block=None):
    """Pallas hot path: sigmoid + per-mask class selection.

    Args:
      x:      [N, C, M, M] float mask logits (NCHW layout).
      labels: [N] int class index per mask.
    Returns:
      [N, 1, M, M] selected mask probabilities.
    """
    N, C, H, W = x.shape
    HW = H * W

    if block is None:
        block = min(32, _round_up(N, 8))
    block = max(8, _round_up(block, 8))     # keep sublane-aligned (multiple of 8)
    n_pad = _round_up(N, block)
    grid = n_pad // block

    x_flat = x.reshape(N, C, HW)
    labels = jnp.clip(labels.astype(jnp.int32), 0, C - 1)

    kernel = functools.partial(_gather_sigmoid_kernel, block=block, n_total=N)

    out = pl.pallas_call(
        kernel,
        out_shape=jax.ShapeDtypeStruct((n_pad, HW), x.dtype),
        grid_spec=pltpu.PrefetchScalarGridSpec(
            num_scalar_prefetch=1,
            grid=(grid,),
            in_specs=[
                pl.BlockSpec(memory_space=pl.ANY),      # x stays in HBM
            ],
            out_specs=pl.BlockSpec((block, HW), lambda i, labels: (i, 0)),
            scratch_shapes=[
                pltpu.VMEM((block, HW), x.dtype),        # gather buffer
                pltpu.SemaphoreType.DMA((block,)),       # one sem per row copy
            ],
        ),
        compiler_params=pltpu.CompilerParams(
            dimension_semantics=("parallel",),           # independent mask blocks
        ),
    )(labels, x_flat)

    return out[:N].reshape(N, 1, H, W)


def mask_post_processor(x, boxes_labels, boxes_per_image):
    """Full forward: kernel hot path + glue (split per image).

    Args:
      x:               [N, C, M, M] mask logits.
      boxes_labels:    list of per-image int label arrays (concatenated length = N).
      boxes_per_image: list of ints, number of boxes per image.
    Returns:
      list of per-image mask probability arrays, each [n_i, 1, M, M]
      (the 'mask' field added to each BoxList in the PyTorch module).
    """
    labels = jnp.concatenate([jnp.asarray(l, dtype=jnp.int32) for l in boxes_labels])
    mask_prob = mask_post_process_probs(x, labels)
    # Glue: split along dim 0 per image (mirrors torch .split(boxes_per_image, 0)).
    # TODO(synk): BoxList field bookkeeping and .cpu().numpy() host conversion have
    # no kernel equivalent; only the tensor math is implemented.
    splits = np.cumsum(boxes_per_image)[:-1].tolist()
    return jnp.split(mask_prob, splits, axis=0)


if __name__ == "__main__":
    key = jax.random.PRNGKey(0)
    k_x, k_l = jax.random.split(key)

    # Small shapes: 8 masks total (5 + 3 across two images), 4 classes, 16x16 masks.
    N, C, M = 8, 4, 16
    boxes_per_image = [5, 3]

    x = jax.random.normal(k_x, (N, C, M, M), dtype=jnp.float32)
    labels_all = jax.random.randint(k_l, (N,), 0, C, dtype=jnp.int32)
    boxes_labels = [labels_all[:5], labels_all[5:]]

    results = mask_post_processor(x, boxes_labels, boxes_per_image)
    results = [jax.block_until_ready(r) for r in results]

    # Reference (plain JAX) check of the forward semantics.
    # Tolerance is loosened slightly because the kernel uses the EUP approximate
    # reciprocal (rel. err ~1e-4) for the sigmoid denominator.
    ref = jax.nn.sigmoid(x)[jnp.arange(N), labels_all][:, None]
    ref_splits = jnp.split(ref, np.cumsum(boxes_per_image)[:-1].tolist(), axis=0)
    for got, want, n in zip(results, ref_splits, boxes_per_image):
        assert got.shape == (n, 1, M, M), got.shape
        np.testing.assert_allclose(np.asarray(got), np.asarray(want),
                                   rtol=2e-3, atol=2e-3)

    print("KERNEL_OK")
</pallas_src>

<mosaic_0001>
module attributes {stable_mosaic.version = 11 : i64} {
  func.func @_gather_sigmoid_kernel(%arg0: i32, %arg1: memref<8xi32, #tpu.memory_space<smem>>, %arg2: memref<8x4x256xf32, #tpu.memory_space<any>>, %arg3: memref<8x256xf32, #tpu.memory_space<vmem>>, %arg4: memref<8x256xf32, #tpu.memory_space<vmem>>, %arg5: memref<8x!tpu.dma_semaphore, #tpu.memory_space<semaphore_mem>>) attributes {dimension_semantics = [#tpu.dimension_semantics<parallel>], iteration_bounds = array<i64: 1>, scalar_prefetch = 1 : i64, scratch_operands = 2 : i64, tpu.core_type = #tpu.core_type<tc>, window_params = [{}, {transform_indices = @transform_1, window_bounds = array<i64: 8, 256>}]} {
    %c8_i32 = arith.constant 8 : i32
    %0 = arith.muli %arg0, %c8_i32 : i32
    %c0_i32 = arith.constant 0 : i32
    %1 = arith.addi %0, %c0_i32 : i32
    %c7_i32 = arith.constant 7 : i32
    %2 = arith.minsi %1, %c7_i32 : i32
    %3 = arith.index_cast %2 : i32 to index
    %4 = memref.load %arg1[%3] : memref<8xi32, #tpu.memory_space<smem>>
    %c1_i32 = arith.constant 1 : i32
    %5 = arith.addi %0, %c1_i32 : i32
    %c7_i32_0 = arith.constant 7 : i32
    %6 = arith.minsi %5, %c7_i32_0 : i32
    %7 = arith.index_cast %6 : i32 to index
    %8 = memref.load %arg1[%7] : memref<8xi32, #tpu.memory_space<smem>>
    %c2_i32 = arith.constant 2 : i32
    %9 = arith.addi %0, %c2_i32 : i32
    %c7_i32_1 = arith.constant 7 : i32
    %10 = arith.minsi %9, %c7_i32_1 : i32
    %11 = arith.index_cast %10 : i32 to index
    %12 = memref.load %arg1[%11] : memref<8xi32, #tpu.memory_space<smem>>
    %c3_i32 = arith.constant 3 : i32
    %13 = arith.addi %0, %c3_i32 : i32
    %c7_i32_2 = arith.constant 7 : i32
    %14 = arith.minsi %13, %c7_i32_2 : i32
    %15 = arith.index_cast %14 : i32 to index
    %16 = memref.load %arg1[%15] : memref<8xi32, #tpu.memory_space<smem>>
    %c4_i32 = arith.constant 4 : i32
    %17 = arith.addi %0, %c4_i32 : i32
    %c7_i32_3 = arith.constant 7 : i32
    %18 = arith.minsi %17, %c7_i32_3 : i32
    %19 = arith.index_cast %18 : i32 to index
    %20 = memref.load %arg1[%19] : memref<8xi32, #tpu.memory_space<smem>>
    %c5_i32 = arith.constant 5 : i32
    %21 = arith.addi %0, %c5_i32 : i32
    %c7_i32_4 = arith.constant 7 : i32
    %22 = arith.minsi %21, %c7_i32_4 : i32
    %23 = arith.index_cast %22 : i32 to index
    %24 = memref.load %arg1[%23] : memref<8xi32, #tpu.memory_space<smem>>
    %c6_i32 = arith.constant 6 : i32
    %25 = arith.addi %0, %c6_i32 : i32
    %c7_i32_5 = arith.constant 7 : i32
    %26 = arith.minsi %25, %c7_i32_5 : i32
    %27 = arith.index_cast %26 : i32 to index
    %28 = memref.load %arg1[%27] : memref<8xi32, #tpu.memory_space<smem>>
    %c7_i32_6 = arith.constant 7 : i32
    %29 = arith.addi %0, %c7_i32_6 : i32
    %c7_i32_7 = arith.constant 7 : i32
    %30 = arith.minsi %29, %c7_i32_7 : i32
    %31 = arith.index_cast %30 : i32 to index
    %32 = memref.load %arg1[%31] : memref<8xi32, #tpu.memory_space<smem>>
    %c0_i32_8 = arith.constant 0 : i32
    %c0_i32_9 = arith.constant 0 : i32
    %c0_i32_10 = arith.constant 0 : i32
    %33 = tpu.memref_slice %arg2[%2, %4, %c0_i32_10] : memref<8x4x256xf32, #tpu.memory_space<any>> -> memref<1x1x256xf32, #tpu.memory_space<any>>
    %34 = tpu.memref_squeeze %33 : memref<1x1x256xf32, #tpu.memory_space<any>> -> memref<256xf32, #tpu.memory_space<any>>
    %c0_i32_11 = arith.constant 0 : i32
    %35 = tpu.memref_slice %arg4[%c0_i32_8, %c0_i32_11] : memref<8x256xf32, #tpu.memory_space<vmem>> -> memref<1x256xf32, #tpu.memory_space<vmem>>
    %36 = tpu.memref_squeeze %35 : memref<1x256xf32, #tpu.memory_space<vmem>> -> memref<256xf32, #tpu.memory_space<vmem>>
    %37 = tpu.memref_slice %arg5[%c0_i32_9] : memref<8x!tpu.dma_semaphore, #tpu.memory_space<semaphore_mem>> -> memref<1x!tpu.dma_semaphore, #tpu.memory_space<semaphore_mem>>
    %38 = tpu.memref_squeeze %37 : memref<1x!tpu.dma_semaphore, #tpu.memory_space<semaphore_mem>> -> memref<!tpu.dma_semaphore, #tpu.memory_space<semaphore_mem>>
    tpu.enqueue_dma source(%34 : memref<256xf32, #tpu.memory_space<any>>) target(%36 : memref<256xf32, #tpu.memory_space<vmem>>) target_semaphore(%38 : memref<!tpu.dma_semaphore, #tpu.memory_space<semaphore_mem>>)
    %c1_i32_12 = arith.constant 1 : i32
    %c1_i32_13 = arith.constant 1 : i32
    %c0_i32_14 = arith.constant 0 : i32
    %39 = tpu.memref_slice %arg2[%6, %8, %c0_i32_14] : memref<8x4x256xf32, #tpu.memory_space<any>> -> memref<1x1x256xf32, #tpu.memory_space<any>>
    %40 = tpu.memref_squeeze %39 : memref<1x1x256xf32, #tpu.memory_space<any>> -> memref<256xf32, #tpu.memory_space<any>>
    %c0_i32_15 = arith.constant 0 : i32
    %41 = tpu.memref_slice %arg4[%c1_i32_12, %c0_i32_15] : memref<8x256xf32, #tpu.memory_space<vmem>> -> memref<1x256xf32, #tpu.memory_space<vmem>>
    %42 = tpu.memref_squeeze %41 : memref<1x256xf32, #tpu.memory_space<vmem>> -> memref<256xf32, #tpu.memory_space<vmem>>
    %43 = tpu.memref_slice %arg5[%c1_i32_13] : memref<8x!tpu.dma_semaphore, #tpu.memory_space<semaphore_mem>> -> memref<1x!tpu.dma_semaphore, #tpu.memory_space<semaphore_mem>>
    %44 = tpu.memref_squeeze %43 : memref<1x!tpu.dma_semaphore, #tpu.memory_space<semaphore_mem>> -> memref<!tpu.dma_semaphore, #tpu.memory_space<semaphore_mem>>
    tpu.enqueue_dma source(%40 : memref<256xf32, #tpu.memory_space<any>>) target(%42 : memref<256xf32, #tpu.memory_space<vmem>>) target_semaphore(%44 : memref<!tpu.dma_semaphore, #tpu.memory_space<semaphore_mem>>)
    %c2_i32_16 = arith.constant 2 : i32
    %c2_i32_17 = arith.constant 2 : i32
    %c0_i32_18 = arith.constant 0 : i32
    %45 = tpu.memref_slice %arg2[%10, %12, %c0_i32_18] : memref<8x4x256xf32, #tpu.memory_space<any>> -> memref<1x1x256xf32, #tpu.memory_space<any>>
    %46 = tpu.memref_squeeze %45 : memref<1x1x256xf32, #tpu.memory_space<any>> -> memref<256xf32, #tpu.memory_space<any>>
    %c0_i32_19 = arith.constant 0 : i32
    %47 = tpu.memref_slice %arg4[%c2_i32_16, %c0_i32_19] : memref<8x256xf32, #tpu.memory_space<vmem>> -> memref<1x256xf32, #tpu.memory_space<vmem>>
    %48 = tpu.memref_squeeze %47 : memref<1x256xf32, #tpu.memory_space<vmem>> -> memref<256xf32, #tpu.memory_space<vmem>>
    %49 = tpu.memref_slice %arg5[%c2_i32_17] : memref<8x!tpu.dma_semaphore, #tpu.memory_space<semaphore_mem>> -> memref<1x!tpu.dma_semaphore, #tpu.memory_space<semaphore_mem>>
    %50 = tpu.memref_squeeze %49 : memref<1x!tpu.dma_semaphore, #tpu.memory_space<semaphore_mem>> -> memref<!tpu.dma_semaphore, #tpu.memory_space<semaphore_mem>>
    tpu.enqueue_dma source(%46 : memref<256xf32, #tpu.memory_space<any>>) target(%48 : memref<256xf32, #tpu.memory_space<vmem>>) target_semaphore(%50 : memref<!tpu.dma_semaphore, #tpu.memory_space<semaphore_mem>>)
    %c3_i32_20 = arith.constant 3 : i32
    %c3_i32_21 = arith.constant 3 : i32
    %c0_i32_22 = arith.constant 0 : i32
    %51 = tpu.memref_slice %arg2[%14, %16, %c0_i32_22] : memref<8x4x256xf32, #tpu.memory_space<any>> -> memref<1x1x256xf32, #tpu.memory_space<any>>
    %52 = tpu.memref_squeeze %51 : memref<1x1x256xf32, #tpu.memory_space<any>> -> memref<256xf32, #tpu.memory_space<any>>
    %c0_i32_23 = arith.constant 0 : i32
    %53 = tpu.memref_slice %arg4[%c3_i32_20, %c0_i32_23] : memref<8x256xf32, #tpu.memory_space<vmem>> -> memref<1x256xf32, #tpu.memory_space<vmem>>
    %54 = tpu.memref_squeeze %53 : memref<1x256xf32, #tpu.memory_space<vmem>> -> memref<256xf32, #tpu.memory_space<vmem>>
    %55 = tpu.memref_slice %arg5[%c3_i32_21] : memref<8x!tpu.dma_semaphore, #tpu.memory_space<semaphore_mem>> -> memref<1x!tpu.dma_semaphore, #tpu.memory_space<semaphore_mem>>
    %56 = tpu.memref_squeeze %55 : memref<1x!tpu.dma_semaphore, #tpu.memory_space<semaphore_mem>> -> memref<!tpu.dma_semaphore, #tpu.memory_space<semaphore_mem>>
    tpu.enqueue_dma source(%52 : memref<256xf32, #tpu.memory_space<any>>) target(%54 : memref<256xf32, #tpu.memory_space<vmem>>) target_semaphore(%56 : memref<!tpu.dma_semaphore, #tpu.memory_space<semaphore_mem>>)
    %c4_i32_24 = arith.constant 4 : i32
    %c4_i32_25 = arith.constant 4 : i32
    %c0_i32_26 = arith.constant 0 : i32
    %57 = tpu.memref_slice %arg2[%18, %20, %c0_i32_26] : memref<8x4x256xf32, #tpu.memory_space<any>> -> memref<1x1x256xf32, #tpu.memory_space<any>>
    %58 = tpu.memref_squeeze %57 : memref<1x1x256xf32, #tpu.memory_space<any>> -> memref<256xf32, #tpu.memory_space<any>>
    %c0_i32_27 = arith.constant 0 : i32
    %59 = tpu.memref_slice %arg4[%c4_i32_24, %c0_i32_27] : memref<8x256xf32, #tpu.memory_space<vmem>> -> memref<1x256xf32, #tpu.memory_space<vmem>>
    %60 = tpu.memref_squeeze %59 : memref<1x256xf32, #tpu.memory_space<vmem>> -> memref<256xf32, #tpu.memory_space<vmem>>
    %61 = tpu.memref_slice %arg5[%c4_i32_25] : memref<8x!tpu.dma_semaphore, #tpu.memory_space<semaphore_mem>> -> memref<1x!tpu.dma_semaphore, #tpu.memory_space<semaphore_mem>>
    %62 = tpu.memref_squeeze %61 : memref<1x!tpu.dma_semaphore, #tpu.memory_space<semaphore_mem>> -> memref<!tpu.dma_semaphore, #tpu.memory_space<semaphore_mem>>
    tpu.enqueue_dma source(%58 : memref<256xf32, #tpu.memory_space<any>>) target(%60 : memref<256xf32, #tpu.memory_space<vmem>>) target_semaphore(%62 : memref<!tpu.dma_semaphore, #tpu.memory_space<semaphore_mem>>)
    %c5_i32_28 = arith.constant 5 : i32
    %c5_i32_29 = arith.constant 5 : i32
    %c0_i32_30 = arith.constant 0 : i32
    %63 = tpu.memref_slice %arg2[%22, %24, %c0_i32_30] : memref<8x4x256xf32, #tpu.memory_space<any>> -> memref<1x1x256xf32, #tpu.memory_space<any>>
    %64 = tpu.memref_squeeze %63 : memref<1x1x256xf32, #tpu.memory_space<any>> -> memref<256xf32, #tpu.memory_space<any>>
    %c0_i32_31 = arith.constant 0 : i32
    %65 = tpu.memref_slice %arg4[%c5_i32_28, %c0_i32_31] : memref<8x256xf32, #tpu.memory_space<vmem>> -> memref<1x256xf32, #tpu.memory_space<vmem>>
    %66 = tpu.memref_squeeze %65 : memref<1x256xf32, #tpu.memory_space<vmem>> -> memref<256xf32, #tpu.memory_space<vmem>>
    %67 = tpu.memref_slice %arg5[%c5_i32_29] : memref<8x!tpu.dma_semaphore, #tpu.memory_space<semaphore_mem>> -> memref<1x!tpu.dma_semaphore, #tpu.memory_space<semaphore_mem>>
    %68 = tpu.memref_squeeze %67 : memref<1x!tpu.dma_semaphore, #tpu.memory_space<semaphore_mem>> -> memref<!tpu.dma_semaphore, #tpu.memory_space<semaphore_mem>>
    tpu.enqueue_dma source(%64 : memref<256xf32, #tpu.memory_space<any>>) target(%66 : memref<256xf32, #tpu.memory_space<vmem>>) target_semaphore(%68 : memref<!tpu.dma_semaphore, #tpu.memory_space<semaphore_mem>>)
    %c6_i32_32 = arith.constant 6 : i32
    %c6_i32_33 = arith.constant 6 : i32
    %c0_i32_34 = arith.constant 0 : i32
    %69 = tpu.memref_slice %arg2[%26, %28, %c0_i32_34] : memref<8x4x256xf32, #tpu.memory_space<any>> -> memref<1x1x256xf32, #tpu.memory_space<any>>
    %70 = tpu.memref_squeeze %69 : memref<1x1x256xf32, #tpu.memory_space<any>> -> memref<256xf32, #tpu.memory_space<any>>
    %c0_i32_35 = arith.constant 0 : i32
    %71 = tpu.memref_slice %arg4[%c6_i32_32, %c0_i32_35] : memref<8x256xf32, #tpu.memory_space<vmem>> -> memref<1x256xf32, #tpu.memory_space<vmem>>
    %72 = tpu.memref_squeeze %71 : memref<1x256xf32, #tpu.memory_space<vmem>> -> memref<256xf32, #tpu.memory_space<vmem>>
    %73 = tpu.memref_slice %arg5[%c6_i32_33] : memref<8x!tpu.dma_semaphore, #tpu.memory_space<semaphore_mem>> -> memref<1x!tpu.dma_semaphore, #tpu.memory_space<semaphore_mem>>
    %74 = tpu.memref_squeeze %73 : memref<1x!tpu.dma_semaphore, #tpu.memory_space<semaphore_mem>> -> memref<!tpu.dma_semaphore, #tpu.memory_space<semaphore_mem>>
    tpu.enqueue_dma source(%70 : memref<256xf32, #tpu.memory_space<any>>) target(%72 : memref<256xf32, #tpu.memory_space<vmem>>) target_semaphore(%74 : memref<!tpu.dma_semaphore, #tpu.memory_space<semaphore_mem>>)
    %c7_i32_36 = arith.constant 7 : i32
    %c7_i32_37 = arith.constant 7 : i32
    %c0_i32_38 = arith.constant 0 : i32
    %75 = tpu.memref_slice %arg2[%30, %32, %c0_i32_38] : memref<8x4x256xf32, #tpu.memory_space<any>> -> memref<1x1x256xf32, #tpu.memory_space<any>>
    %76 = tpu.memref_squeeze %75 : memref<1x1x256xf32, #tpu.memory_space<any>> -> memref<256xf32, #tpu.memory_space<any>>
    %c0_i32_39 = arith.constant 0 : i32
    %77 = tpu.memref_slice %arg4[%c7_i32_36, %c0_i32_39] : memref<8x256xf32, #tpu.memory_space<vmem>> -> memref<1x256xf32, #tpu.memory_space<vmem>>
    %78 = tpu.memref_squeeze %77 : memref<1x256xf32, #tpu.memory_space<vmem>> -> memref<256xf32, #tpu.memory_space<vmem>>
    %79 = tpu.memref_slice %arg5[%c7_i32_37] : memref<8x!tpu.dma_semaphore, #tpu.memory_space<semaphore_mem>> -> memref<1x!tpu.dma_semaphore, #tpu.memory_space<semaphore_mem>>
    %80 = tpu.memref_squeeze %79 : memref<1x!tpu.dma_semaphore, #tpu.memory_space<semaphore_mem>> -> memref<!tpu.dma_semaphore, #tpu.memory_space<semaphore_mem>>
    tpu.enqueue_dma source(%76 : memref<256xf32, #tpu.memory_space<any>>) target(%78 : memref<256xf32, #tpu.memory_space<vmem>>) target_semaphore(%80 : memref<!tpu.dma_semaphore, #tpu.memory_space<semaphore_mem>>)
    %c0_i32_40 = arith.constant 0 : i32
    %c0_i32_41 = arith.constant 0 : i32
    %c0_i32_42 = arith.constant 0 : i32
    %81 = tpu.memref_slice %arg2[%2, %4, %c0_i32_42] : memref<8x4x256xf32, #tpu.memory_space<any>> -> memref<1x1x256xf32, #tpu.memory_space<any>>
    %82 = tpu.memref_squeeze %81 : memref<1x1x256xf32, #tpu.memory_space<any>> -> memref<256xf32, #tpu.memory_space<any>>
    %c0_i32_43 = arith.constant 0 : i32
    %83 = tpu.memref_slice %arg4[%c0_i32_40, %c0_i32_43] : memref<8x256xf32, #tpu.memory_space<vmem>> -> memref<1x256xf32, #tpu.memory_space<vmem>>
    %84 = tpu.memref_squeeze %83 : memref<1x256xf32, #tpu.memory_space<vmem>> -> memref<256xf32, #tpu.memory_space<vmem>>
    %85 = tpu.memref_slice %arg5[%c0_i32_41] : memref<8x!tpu.dma_semaphore, #tpu.memory_space<semaphore_mem>> -> memref<1x!tpu.dma_semaphore, #tpu.memory_space<semaphore_mem>>
    %86 = tpu.memref_squeeze %85 : memref<1x!tpu.dma_semaphore, #tpu.memory_space<semaphore_mem>> -> memref<!tpu.dma_semaphore, #tpu.memory_space<semaphore_mem>>
    tpu.wait_dma2 semaphore(%86 : memref<!tpu.dma_semaphore, #tpu.memory_space<semaphore_mem>>) src(%82 : memref<256xf32, #tpu.memory_space<any>>) dst(%84 : memref<256xf32, #tpu.memory_space<vmem>>)
    %c1_i32_44 = arith.constant 1 : i32
    %c1_i32_45 = arith.constant 1 : i32
    %c0_i32_46 = arith.constant 0 : i32
    %87 = tpu.memref_slice %arg2[%6, %8, %c0_i32_46] : memref<8x4x256xf32, #tpu.memory_space<any>> -> memref<1x1x256xf32, #tpu.memory_space<any>>
    %88 = tpu.memref_squeeze %87 : memref<1x1x256xf32, #tpu.memory_space<any>> -> memref<256xf32, #tpu.memory_space<any>>
    %c0_i32_47 = arith.constant 0 : i32
    %89 = tpu.memref_slice %arg4[%c1_i32_44, %c0_i32_47] : memref<8x256xf32, #tpu.memory_space<vmem>> -> memref<1x256xf32, #tpu.memory_space<vmem>>
    %90 = tpu.memref_squeeze %89 : memref<1x256xf32, #tpu.memory_space<vmem>> -> memref<256xf32, #tpu.memory_space<vmem>>
    %91 = tpu.memref_slice %arg5[%c1_i32_45] : memref<8x!tpu.dma_semaphore, #tpu.memory_space<semaphore_mem>> -> memref<1x!tpu.dma_semaphore, #tpu.memory_space<semaphore_mem>>
    %92 = tpu.memref_squeeze %91 : memref<1x!tpu.dma_semaphore, #tpu.memory_space<semaphore_mem>> -> memref<!tpu.dma_semaphore, #tpu.memory_space<semaphore_mem>>
    tpu.wait_dma2 semaphore(%92 : memref<!tpu.dma_semaphore, #tpu.memory_space<semaphore_mem>>) src(%88 : memref<256xf32, #tpu.memory_space<any>>) dst(%90 : memref<256xf32, #tpu.memory_space<vmem>>)
    %c2_i32_48 = arith.constant 2 : i32
    %c2_i32_49 = arith.constant 2 : i32
    %c0_i32_50 = arith.constant 0 : i32
    %93 = tpu.memref_slice %arg2[%10, %12, %c0_i32_50] : memref<8x4x256xf32, #tpu.memory_space<any>> -> memref<1x1x256xf32, #tpu.memory_space<any>>
    %94 = tpu.memref_squeeze %93 : memref<1x1x256xf32, #tpu.memory_space<any>> -> memref<256xf32, #tpu.memory_space<any>>
    %c0_i32_51 = arith.constant 0 : i32
    %95 = tpu.memref_slice %arg4[%c2_i32_48, %c0_i32_51] : memref<8x256xf32, #tpu.memory_space<vmem>> -> memref<1x256xf32, #tpu.memory_space<vmem>>
    %96 = tpu.memref_squeeze %95 : memref<1x256xf32, #tpu.memory_space<vmem>> -> memref<256xf32, #tpu.memory_space<vmem>>
    %97 = tpu.memref_slice %arg5[%c2_i32_49] : memref<8x!tpu.dma_semaphore, #tpu.memory_space<semaphore_mem>> -> memref<1x!tpu.dma_semaphore, #tpu.memory_space<semaphore_mem>>
    %98 = tpu.memref_squeeze %97 : memref<1x!tpu.dma_semaphore, #tpu.memory_space<semaphore_mem>> -> memref<!tpu.dma_semaphore, #tpu.memory_space<semaphore_mem>>
    tpu.wait_dma2 semaphore(%98 : memref<!tpu.dma_semaphore, #tpu.memory_space<semaphore_mem>>) src(%94 : memref<256xf32, #tpu.memory_space<any>>) dst(%96 : memref<256xf32, #tpu.memory_space<vmem>>)
    %c3_i32_52 = arith.constant 3 : i32
    %c3_i32_53 = arith.constant 3 : i32
    %c0_i32_54 = arith.constant 0 : i32
    %99 = tpu.memref_slice %arg2[%14, %16, %c0_i32_54] : memref<8x4x256xf32, #tpu.memory_space<any>> -> memref<1x1x256xf32, #tpu.memory_space<any>>
    %100 = tpu.memref_squeeze %99 : memref<1x1x256xf32, #tpu.memory_space<any>> -> memref<256xf32, #tpu.memory_space<any>>
    %c0_i32_55 = arith.constant 0 : i32
    %101 = tpu.memref_slice %arg4[%c3_i32_52, %c0_i32_55] : memref<8x256xf32, #tpu.memory_space<vmem>> -> memref<1x256xf32, #tpu.memory_space<vmem>>
    %102 = tpu.memref_squeeze %101 : memref<1x256xf32, #tpu.memory_space<vmem>> -> memref<256xf32, #tpu.memory_space<vmem>>
    %103 = tpu.memref_slice %arg5[%c3_i32_53] : memref<8x!tpu.dma_semaphore, #tpu.memory_space<semaphore_mem>> -> memref<1x!tpu.dma_semaphore, #tpu.memory_space<semaphore_mem>>
    %104 = tpu.memref_squeeze %103 : memref<1x!tpu.dma_semaphore, #tpu.memory_space<semaphore_mem>> -> memref<!tpu.dma_semaphore, #tpu.memory_space<semaphore_mem>>
    tpu.wait_dma2 semaphore(%104 : memref<!tpu.dma_semaphore, #tpu.memory_space<semaphore_mem>>) src(%100 : memref<256xf32, #tpu.memory_space<any>>) dst(%102 : memref<256xf32, #tpu.memory_space<vmem>>)
    %c4_i32_56 = arith.constant 4 : i32
    %c4_i32_57 = arith.constant 4 : i32
    %c0_i32_58 = arith.constant 0 : i32
    %105 = tpu.memref_slice %arg2[%18, %20, %c0_i32_58] : memref<8x4x256xf32, #tpu.memory_space<any>> -> memref<1x1x256xf32, #tpu.memory_space<any>>
    %106 = tpu.memref_squeeze %105 : memref<1x1x256xf32, #tpu.memory_space<any>> -> memref<256xf32, #tpu.memory_space<any>>
    %c0_i32_59 = arith.constant 0 : i32
    %107 = tpu.memref_slice %arg4[%c4_i32_56, %c0_i32_59] : memref<8x256xf32, #tpu.memory_space<vmem>> -> memref<1x256xf32, #tpu.memory_space<vmem>>
    %108 = tpu.memref_squeeze %107 : memref<1x256xf32, #tpu.memory_space<vmem>> -> memref<256xf32, #tpu.memory_space<vmem>>
    %109 = tpu.memref_slice %arg5[%c4_i32_57] : memref<8x!tpu.dma_semaphore, #tpu.memory_space<semaphore_mem>> -> memref<1x!tpu.dma_semaphore, #tpu.memory_space<semaphore_mem>>
    %110 = tpu.memref_squeeze %109 : memref<1x!tpu.dma_semaphore, #tpu.memory_space<semaphore_mem>> -> memref<!tpu.dma_semaphore, #tpu.memory_space<semaphore_mem>>
    tpu.wait_dma2 semaphore(%110 : memref<!tpu.dma_semaphore, #tpu.memory_space<semaphore_mem>>) src(%106 : memref<256xf32, #tpu.memory_space<any>>) dst(%108 : memref<256xf32, #tpu.memory_space<vmem>>)
    %c5_i32_60 = arith.constant 5 : i32
    %c5_i32_61 = arith.constant 5 : i32
    %c0_i32_62 = arith.constant 0 : i32
    %111 = tpu.memref_slice %arg2[%22, %24, %c0_i32_62] : memref<8x4x256xf32, #tpu.memory_space<any>> -> memref<1x1x256xf32, #tpu.memory_space<any>>
    %112 = tpu.memref_squeeze %111 : memref<1x1x256xf32, #tpu.memory_space<any>> -> memref<256xf32, #tpu.memory_space<any>>
    %c0_i32_63 = arith.constant 0 : i32
    %113 = tpu.memref_slice %arg4[%c5_i32_60, %c0_i32_63] : memref<8x256xf32, #tpu.memory_space<vmem>> -> memref<1x256xf32, #tpu.memory_space<vmem>>
    %114 = tpu.memref_squeeze %113 : memref<1x256xf32, #tpu.memory_space<vmem>> -> memref<256xf32, #tpu.memory_space<vmem>>
    %115 = tpu.memref_slice %arg5[%c5_i32_61] : memref<8x!tpu.dma_semaphore, #tpu.memory_space<semaphore_mem>> -> memref<1x!tpu.dma_semaphore, #tpu.memory_space<semaphore_mem>>
    %116 = tpu.memref_squeeze %115 : memref<1x!tpu.dma_semaphore, #tpu.memory_space<semaphore_mem>> -> memref<!tpu.dma_semaphore, #tpu.memory_space<semaphore_mem>>
    tpu.wait_dma2 semaphore(%116 : memref<!tpu.dma_semaphore, #tpu.memory_space<semaphore_mem>>) src(%112 : memref<256xf32, #tpu.memory_space<any>>) dst(%114 : memref<256xf32, #tpu.memory_space<vmem>>)
    %c6_i32_64 = arith.constant 6 : i32
    %c6_i32_65 = arith.constant 6 : i32
    %c0_i32_66 = arith.constant 0 : i32
    %117 = tpu.memref_slice %arg2[%26, %28, %c0_i32_66] : memref<8x4x256xf32, #tpu.memory_space<any>> -> memref<1x1x256xf32, #tpu.memory_space<any>>
    %118 = tpu.memref_squeeze %117 : memref<1x1x256xf32, #tpu.memory_space<any>> -> memref<256xf32, #tpu.memory_space<any>>
    %c0_i32_67 = arith.constant 0 : i32
    %119 = tpu.memref_slice %arg4[%c6_i32_64, %c0_i32_67] : memref<8x256xf32, #tpu.memory_space<vmem>> -> memref<1x256xf32, #tpu.memory_space<vmem>>
    %120 = tpu.memref_squeeze %119 : memref<1x256xf32, #tpu.memory_space<vmem>> -> memref<256xf32, #tpu.memory_space<vmem>>
    %121 = tpu.memref_slice %arg5[%c6_i32_65] : memref<8x!tpu.dma_semaphore, #tpu.memory_space<semaphore_mem>> -> memref<1x!tpu.dma_semaphore, #tpu.memory_space<semaphore_mem>>
    %122 = tpu.memref_squeeze %121 : memref<1x!tpu.dma_semaphore, #tpu.memory_space<semaphore_mem>> -> memref<!tpu.dma_semaphore, #tpu.memory_space<semaphore_mem>>
    tpu.wait_dma2 semaphore(%122 : memref<!tpu.dma_semaphore, #tpu.memory_space<semaphore_mem>>) src(%118 : memref<256xf32, #tpu.memory_space<any>>) dst(%120 : memref<256xf32, #tpu.memory_space<vmem>>)
    %c7_i32_68 = arith.constant 7 : i32
    %c7_i32_69 = arith.constant 7 : i32
    %c0_i32_70 = arith.constant 0 : i32
    %123 = tpu.memref_slice %arg2[%30, %32, %c0_i32_70] : memref<8x4x256xf32, #tpu.memory_space<any>> -> memref<1x1x256xf32, #tpu.memory_space<any>>
    %124 = tpu.memref_squeeze %123 : memref<1x1x256xf32, #tpu.memory_space<any>> -> memref<256xf32, #tpu.memory_space<any>>
    %c0_i32_71 = arith.constant 0 : i32
    %125 = tpu.memref_slice %arg4[%c7_i32_68, %c0_i32_71] : memref<8x256xf32, #tpu.memory_space<vmem>> -> memref<1x256xf32, #tpu.memory_space<vmem>>
    %126 = tpu.memref_squeeze %125 : memref<1x256xf32, #tpu.memory_space<vmem>> -> memref<256xf32, #tpu.memory_space<vmem>>
    %127 = tpu.memref_slice %arg5[%c7_i32_69] : memref<8x!tpu.dma_semaphore, #tpu.memory_space<semaphore_mem>> -> memref<1x!tpu.dma_semaphore, #tpu.memory_space<semaphore_mem>>
    %128 = tpu.memref_squeeze %127 : memref<1x!tpu.dma_semaphore, #tpu.memory_space<semaphore_mem>> -> memref<!tpu.dma_semaphore, #tpu.memory_space<semaphore_mem>>
    tpu.wait_dma2 semaphore(%128 : memref<!tpu.dma_semaphore, #tpu.memory_space<semaphore_mem>>) src(%124 : memref<256xf32, #tpu.memory_space<any>>) dst(%126 : memref<256xf32, #tpu.memory_space<vmem>>)
    %c0 = arith.constant 0 : index
    %c0_72 = arith.constant 0 : index
    %129 = vector.load %arg4[%c0, %c0_72] : memref<8x256xf32, #tpu.memory_space<vmem>>, vector<8x256xf32>
    %cst = arith.constant 0.000000e+00 : f32
    %130 = vector.broadcast %cst : f32 to vector<8x256xf32>
    %131 = arith.subf %130, %129 : vector<8x256xf32>
    %132 = math.exp %131 : vector<8x256xf32>
    %cst_73 = arith.constant 1.000000e+00 : f32
    %133 = vector.broadcast %cst_73 : f32 to vector<8x256xf32>
    %134 = arith.addf %133, %132 : vector<8x256xf32>
    %135 = tpu.reciprocal %134 {approx = true} : vector<8x256xf32> -> vector<8x256xf32>
    %c0_74 = arith.constant 0 : index
    %c0_75 = arith.constant 0 : index
    %136 = vector.load %arg3[%c0_74, %c0_75] : memref<8x256xf32, #tpu.memory_space<vmem>>, vector<8x256xf32>
    tpu.vector_store %arg3[%c0_74, %c0_75], %135 {strides = array<i32>} : memref<8x256xf32, #tpu.memory_space<vmem>>, vector<8x256xf32>,
    return
  }
  func.func @transform_1(%arg0: i32, %arg1: memref<8xi32, #tpu.memory_space<smem>>) -> (i32, i32) {
    %c0_i32 = arith.constant 0 : i32
    %c0_i32_0 = arith.constant 0 : i32
    return %arg0, %c0_i32 : i32, i32
  }
}

</mosaic_0001>

<bundles_post_ra>
// kernel: tpu_custom_call.1
= control target key start
LH: loop header
LB: loop body
LE: loop exit
PB: predicated region body
PF: predicated region fallthrough
CT: control target
= control target key end

     0   :  { %s828_s0 = inlined_call_operand.hbm [shape: s32[8], index: 0, kind: input, shape index: {}]   ;;  %s829_s1 = inlined_call_operand.hbm [shape: f32[8,4,256], index: 1, kind: input, shape index: {}]   ;;  %s830_s2 = inlined_call_operand.hbm [shape: f32[8,256], index: 2, kind: output, shape index: {}]  }
   0x1   :  { %s375_s11 = scalar_lea.hbm %s828_s0, 16 }
   0x2   :  { %p376_p0 = scmp.ne.s32.totalorder %s828_s0, %s375_s11  ;;  %p379_p1 = scmp.lt.u32.totalorder %s375_s11, %s828_s0 }
   0x4   :  { %p381_p2 = pnand %p379_p1, %p376_p0 }
   0x6   :  { %384 = shalt.err (!%p381_p2)  }
   0x7   :  { %s619_s16 = smov [#allocation5]  }
   0x8   :  { %8 = dma.hbm_to_smem %s828_s0, 16, %s619_s16, [#allocation4] }
   0x9   :  { %599 = dma.done.wait [#allocation4], 16 }
   0xa   :  { %600 = vsyncadd [#allocation4], 4294967280 }
   0xb   :  { %10 = sfence }
   0xc   :  { %11 = vsyncpa [#allocation7], 0  ;;  %s15_s19 = sld [smem:[#allocation5]]  ;;  %s620_s20 = smov [#allocation2]  }
   0xd   :  { %s53_s21 = sshll.u32 %s620_s20, 4  ;;  %s661_s22 = sld [smem:[#allocation5 + $0x1]]  ;;  %s659_s21 = int_to_ptr.vmem [resolvable:$true] %s53_s21 }
   0xe   :  { %s663_s23 = sld [smem:[#allocation5 + $0x2]]  ;;  %s621_s24 = smov [#allocation2 + $0x1]  }
   0xf   :  { %s68_s25 = sshll.u32 %s621_s24, 4  ;;  %s622_s29 = smov [#allocation2 + $0x2]   ;;  %s665_s25 = int_to_ptr.vmem [resolvable:$true] %s68_s25 }
  0x10   :  { %s667_s30 = sshll.u32 %s622_s29, 4  ;;  %s677_s12 = scalar_lea.hbm %s829_s1, 1024  ;;  %s84_s30 = int_to_ptr.vmem [resolvable:$true] %s667_s30 }
  0x12   :  { %s44_s26 = sshrl.u32 %s15_s19, 2  ;;  %s45_s27 = sand.u32 3, %s15_s19  }
  0x13   :  { %s316_s0 = sshll.u32 %s44_s26, 3  ;;  %s57_s4 = sshrl.u32 %s661_s22, 2 }
  0x14   :  { %s47_s28 = sadd.s32 %s316_s0, %s45_s27  ;;  %s58_s8 = sand.u32 3, %s661_s22  }
  0x15   :  { %s317_s3 = sshll.u32 %s47_s28, 4 }
  0x16   :  { %s51_s7 = scalar_lea.hbm %s829_s1, %s317_s3 }
  0x17   :  { %s385_s9 = scalar_lea.hbm %s51_s7, 32  ;;  %p388_p4 = scmp.lt.u32.totalorder %s51_s7, %s829_s1 }
  0x18   :  { %p386_p3 = scmp.ne.s32.totalorder %s51_s7, %s385_s9  ;;  %p389_p5 = scmp.lt.u32.totalorder %s677_s12, %s385_s9 }
  0x19   :  { %p391_p7 = scmp.lt.u32.totalorder %s385_s9, %s51_s7 }
  0x1a   :  { %p390_p6 = por %p389_p5, %p388_p4 }
  0x1c   :  { %p392_p8 = por %p391_p7, %p390_p6 }
  0x1e   :  { %p393_p9 = pnand %p392_p8, %p386_p3 }
  0x20   :  { %396 = shalt.err (!%p393_p9)  }
  0x21   :  { %s397_s15 = scalar_lea.vmem %s659_s21, 32  ;;  %s686_s16 = scalar_lea.vmem %s659_s21, 256 }
  0x22   :  { %p398_p10 = scmp.ne.s32.totalorder %s659_s21, %s397_s15  ;;  %p402_p11 = scmp.lt.s32.totalorder %s659_s21, %s659_s21 }
  0x23   :  { %p403_p12 = scmp.lt.s32.totalorder %s686_s16, %s397_s15 }
  0x25   :  { %p404_p13 = por %p403_p12, %p402_p11 }
  0x27   :  { %p405_p0 = pnand %p404_p13, %p398_p10 }
  0x29   :  { %408 = shalt.err (!%p405_p0)  }
  0x2a   :  { %s623_s17 = smov 64   ;;  %s624_s18 = smov 128  }
  0x2b   :  { %s625_s19 = smov 1   ;;  %s318_s20 = sshll.u32 %s57_s4, 3 }
  0x2c   :  { %56 = dma.hbm_to_vmem [thread:$0]  %s51_s7, 32, %s659_s21, [#allocation3], %s623_s17, %s624_s18, %s625_s19 }
  0x2d   :  { %s72_s22 = sshrl.u32 %s663_s23, 2  ;;  %s60_s24 = sadd.s32 %s318_s20, %s58_s8 }
  0x2e   :  { %s73_s26 = sand.u32 3, %s663_s23   ;;  %s340_s27 = sshll.u32 %s60_s24, 4 }
  0x2f   :  { %s320_s0 = sshll.u32 %s72_s22, 3  ;;  %s341_s28 = sadd.s32 128, %s340_s27 }
  0x30   :  { %s75_s29 = sadd.s32 %s320_s0, %s73_s26  ;;  %s64_s6 = scalar_lea.hbm %s829_s1, %s341_s28 }
  0x31   :  { %s342_s9 = sshll.u32 %s75_s29, 4  ;;  %s409_s10 = scalar_lea.hbm %s64_s6, 32 }
  0x32   :  { %p410_p1 = scmp.ne.s32.totalorder %s64_s6, %s409_s10  ;;  %p412_p2 = scmp.lt.u32.totalorder %s64_s6, %s829_s1 }
  0x33   :  { %p413_p3 = scmp.lt.u32.totalorder %s677_s12, %s409_s10  ;;  %p415_p5 = scmp.lt.u32.totalorder %s409_s10, %s64_s6 }
  0x35   :  { %p414_p4 = por %p413_p3, %p412_p2 }
  0x37   :  { %p416_p6 = por %p415_p5, %p414_p4 }
  0x39   :  { %p417_p7 = pnand %p416_p6, %p410_p1 }
  0x3b   :  { %420 = shalt.err (!%p417_p7)  }
  0x3c   :  { %s421_s23 = scalar_lea.vmem %s665_s25, 32  ;;  %p426_p9 = scmp.lt.s32.totalorder %s665_s25, %s659_s21 }
  0x3d   :  { %p422_p8 = scmp.ne.s32.totalorder %s665_s25, %s421_s23  ;;  %p427_p10 = scmp.lt.s32.totalorder %s686_s16, %s421_s23 }
  0x3f   :  { %p428_p11 = por %p427_p10, %p426_p9 }
  0x41   :  { %p429_p12 = pnand %p428_p11, %p422_p8 }
  0x43   :  { %432 = shalt.err (!%p429_p12)  }
  0x44   :  { %71 = dma.hbm_to_vmem [thread:$0]  %s64_s6, 32, %s665_s25, [#allocation3 + $0x1], %s623_s17, %s624_s18, %s625_s19 }
  0x45   :  { %s343_s4 = sadd.s32 256, %s342_s9  ;;  %s717_s15 = sld [smem:[#allocation5 + $0x3]] }
  0x46   :  { %s79_s14 = scalar_lea.hbm %s829_s1, %s343_s4 }
  0x47   :  { %s433_s20 = scalar_lea.hbm %s79_s14, 32  ;;  %p436_p0 = scmp.lt.u32.totalorder %s79_s14, %s829_s1 }
  0x48   :  { %p434_p13 = scmp.ne.s32.totalorder %s79_s14, %s433_s20  ;;  %p437_p1 = scmp.lt.u32.totalorder %s677_s12, %s433_s20 }
  0x49   :  { %p439_p3 = scmp.lt.u32.totalorder %s433_s20, %s79_s14 }
  0x4a   :  { %p438_p2 = por %p437_p1, %p436_p0 }
  0x4c   :  { %p440_p4 = por %p439_p3, %p438_p2 }
  0x4e   :  { %p441_p5 = pnand %p440_p4, %p434_p13 }
  0x50   :  { %444 = shalt.err (!%p441_p5)  }
  0x51   :  { %s445_s25 = scalar_lea.vmem %s84_s30, 32  ;;  %p450_p7 = scmp.lt.s32.totalorder %s84_s30, %s659_s21 }
  0x52   :  { %p446_p6 = scmp.ne.s32.totalorder %s84_s30, %s445_s25  ;;  %p451_p8 = scmp.lt.s32.totalorder %s686_s16, %s445_s25 }
  0x54   :  { %p452_p9 = por %p451_p8, %p450_p7 }
  0x56   :  { %p453_p10 = pnand %p452_p9, %p446_p6 }
  0x58   :  { %456 = shalt.err (!%p453_p10)  }
  0x59   :  { %86 = dma.hbm_to_vmem [thread:$0]  %s79_s14, 32, %s84_s30, [#allocation3 + $0x2], %s623_s17, %s624_s18, %s625_s19 }
  0x5a   :  { %s312_s26 = sld [smem:[#allocation5 + $0x4]]  ;;  %s626_s27 = smov [#allocation2 + $0x3]  }
  0x5b   :  { %s98_s0 = sshll.u32 %s626_s27, 4  ;;  %s627_s28 = smov [#allocation2 + $0x4]   ;;  %s728_s0 = int_to_ptr.vmem [resolvable:$true] %s98_s0 }
  0x5c   :  { %s113_s29 = sshll.u32 %s627_s28, 4  ;;  %s732_s3 = sld [smem:[#allocation5 + $0x5]]  ;;  %s730_s29 = int_to_ptr.vmem [resolvable:$true] %s113_s29 }
  0x5d   :  { %s87_s5 = sshrl.u32 %s717_s15, 2  ;;  %s88_s6 = sand.u32 3, %s717_s15  }
  0x5e   :  { %s322_s9 = sshll.u32 %s87_s5, 3 }
  0x5f   :  { %s90_s10 = sadd.s32 %s322_s9, %s88_s6 }
  0x60   :  { %s102_s11 = sshrl.u32 %s312_s26, 2  ;;  %s344_s13 = sshll.u32 %s90_s10, 4 }
  0x61   :  { %s103_s23 = sand.u32 3, %s312_s26   ;;  %s345_s30 = sadd.s32 384, %s344_s13 }
  0x62   :  { %s324_s4 = sshll.u32 %s102_s11, 3  ;;  %s94_s14 = scalar_lea.hbm %s829_s1, %s345_s30 }
  0x63   :  { %s105_s20 = sadd.s32 %s324_s4, %s103_s23  ;;  %s457_s22 = scalar_lea.hbm %s94_s14, 32 }
  0x64   :  { %p458_p11 = scmp.ne.s32.totalorder %s94_s14, %s457_s22  ;;  %p460_p12 = scmp.lt.u32.totalorder %s94_s14, %s829_s1 }
  0x65   :  { %p461_p13 = scmp.lt.u32.totalorder %s677_s12, %s457_s22  ;;  %p463_p1 = scmp.lt.u32.totalorder %s457_s22, %s94_s14 }
  0x67   :  { %p462_p0 = por %p461_p13, %p460_p12 }
  0x69   :  { %p464_p2 = por %p463_p1, %p462_p0 }
  0x6b   :  { %p465_p3 = pnand %p464_p2, %p458_p11 }
  0x6d   :  { %468 = shalt.err (!%p465_p3)  }
  0x6e   :  { %s469_s15 = scalar_lea.vmem %s728_s0, 32  ;;  %p474_p5 = scmp.lt.s32.totalorder %s728_s0, %s659_s21 }
  0x6f   :  { %p470_p4 = scmp.ne.s32.totalorder %s728_s0, %s469_s15  ;;  %p475_p6 = scmp.lt.s32.totalorder %s686_s16, %s469_s15 }
  0x71   :  { %p476_p7 = por %p475_p6, %p474_p5 }
  0x73   :  { %p477_p8 = pnand %p476_p7, %p470_p4 }
  0x75   :  { %480 = shalt.err (!%p477_p8)  }
  0x76   :  { %101 = dma.hbm_to_vmem [thread:$0]  %s94_s14, 32, %s728_s0, [#allocation3 + $0x3], %s623_s17, %s624_s18, %s625_s19 }
  0x77   :  { %s346_s26 = sshll.u32 %s105_s20, 4  ;;  %s117_s27 = sshrl.u32 %s732_s3, 2 }
  0x78   :  { %s347_s28 = sadd.s32 512, %s346_s26  ;;  %s118_s5 = sand.u32 3, %s732_s3  }
  0x79   :  { %s109_s10 = scalar_lea.hbm %s829_s1, %s347_s28  ;;  %s326_s11 = sshll.u32 %s117_s27, 3 }
  0x7a   :  { %s481_s13 = scalar_lea.hbm %s109_s10, 32  ;;  %p484_p10 = scmp.lt.u32.totalorder %s109_s10, %s829_s1 }
  0x7b   :  { %p482_p9 = scmp.ne.s32.totalorder %s109_s10, %s481_s13  ;;  %p485_p11 = scmp.lt.u32.totalorder %s677_s12, %s481_s13 }
  0x7c   :  { %p487_p13 = scmp.lt.u32.totalorder %s481_s13, %s109_s10 }
  0x7d   :  { %p486_p12 = por %p485_p11, %p484_p10 }
  0x7f   :  { %p488_p0 = por %p487_p13, %p486_p12 }
  0x81   :  { %p489_p1 = pnand %p488_p0, %p482_p9 }
  0x83   :  { %492 = shalt.err (!%p489_p1)  }
  0x84   :  { %s493_s0 = scalar_lea.vmem %s730_s29, 32  ;;  %p498_p3 = scmp.lt.s32.totalorder %s730_s29, %s659_s21 }
  0x85   :  { %p494_p2 = scmp.ne.s32.totalorder %s730_s29, %s493_s0  ;;  %p499_p4 = scmp.lt.s32.totalorder %s686_s16, %s493_s0 }
  0x87   :  { %p500_p5 = por %p499_p4, %p498_p3 }
  0x89   :  { %p501_p6 = pnand %p500_p5, %p494_p2 }
  0x8b   :  { %504 = shalt.err (!%p501_p6)  }
  0x8c   :  { %116 = dma.hbm_to_vmem [thread:$0]  %s109_s10, 32, %s730_s29, [#allocation3 + $0x4], %s623_s17, %s624_s18, %s625_s19 }
  0x8d   :  { %s120_s3 = sadd.s32 %s326_s11, %s118_s5  ;;  %s628_s4 = smov [#allocation2 + $0x5]  }
  0x8e   :  { %s128_s7 = sshll.u32 %s628_s4, 4  ;;  %s348_s8 = sshll.u32 %s120_s3, 4  ;;  %s129_s7 = int_to_ptr.vmem [resolvable:$true] %s128_s7 }
  0x8f   :  { %s349_s14 = sadd.s32 640, %s348_s8  ;;  %s314_s20 = sld [smem:[#allocation5 + $0x6]] }
  0x90   :  { %s124_s25 = scalar_lea.hbm %s829_s1, %s349_s14 }
  0x91   :  { %s505_s15 = scalar_lea.hbm %s124_s25, 32  ;;  %p508_p8 = scmp.lt.u32.totalorder %s124_s25, %s829_s1 }
  0x92   :  { %p506_p7 = scmp.ne.s32.totalorder %s124_s25, %s505_s15  ;;  %p509_p9 = scmp.lt.u32.totalorder %s677_s12, %s505_s15 }
  0x93   :  { %p511_p11 = scmp.lt.u32.totalorder %s505_s15, %s124_s25 }
  0x94   :  { %p510_p10 = por %p509_p9, %p508_p8 }
  0x96   :  { %p512_p12 = por %p511_p11, %p510_p10 }
  0x98   :  { %p513_p13 = pnand %p512_p12, %p506_p7 }
  0x9a   :  { %516 = shalt.err (!%p513_p13)  }
  0x9b   :  { %s517_s29 = scalar_lea.vmem %s129_s7, 32  ;;  %p522_p1 = scmp.lt.s32.totalorder %s129_s7, %s659_s21 }
  0x9c   :  { %p518_p0 = scmp.ne.s32.totalorder %s129_s7, %s517_s29  ;;  %p523_p2 = scmp.lt.s32.totalorder %s686_s16, %s517_s29 }
  0x9e   :  { %p524_p3 = por %p523_p2, %p522_p1 }
  0xa0   :  { %p525_p4 = pnand %p524_p3, %p518_p0 }
  0xa2   :  { %528 = shalt.err (!%p525_p4)  }
  0xa3   :  { %131 = dma.hbm_to_vmem [thread:$0]  %s124_s25, 32, %s129_s7, [#allocation3 + $0x5], %s623_s17, %s624_s18, %s625_s19 }
  0xa4   :  { %s782_s28 = sld [smem:[#allocation5 + $0x7]]  ;;  %s629_s5 = smov [#allocation2 + $0x6]  }
  0xa5   :  { %s143_s6 = sshll.u32 %s629_s5, 4  ;;  %s132_s9 = sshrl.u32 %s314_s20, 2  ;;  %s784_s6 = int_to_ptr.vmem [resolvable:$true] %s143_s6 }
  0xa6   :  { %s133_s10 = sand.u32 3, %s314_s20   ;;  %s328_s11 = sshll.u32 %s132_s9, 3 }
  0xa7   :  { %s135_s13 = sadd.s32 %s328_s11, %s133_s10  ;;  %s630_s23 = smov [#allocation2 + $0x7]  }
  0xa8   :  { %s158_s30 = sshll.u32 %s630_s23, 4  ;;  %s350_s0 = sshll.u32 %s135_s13, 4  ;;  %s159_s30 = int_to_ptr.vmem [resolvable:$true] %s158_s30 }
  0xa9   :  { %s351_s4 = sadd.s32 768, %s350_s0 }
  0xaa   :  { %s147_s3 = sshrl.u32 %s782_s28, 2  ;;  %s148_s8 = sand.u32 3, %s782_s28  }
  0xab   :  { %s139_s22 = scalar_lea.hbm %s829_s1, %s351_s4  ;;  %s330_s24 = sshll.u32 %s147_s3, 3 }
  0xac   :  { %s529_s25 = scalar_lea.hbm %s139_s22, 32  ;;  %p532_p6 = scmp.lt.u32.totalorder %s139_s22, %s829_s1 }
  0xad   :  { %p530_p5 = scmp.ne.s32.totalorder %s139_s22, %s529_s25  ;;  %p533_p7 = scmp.lt.u32.totalorder %s677_s12, %s529_s25 }
  0xae   :  { %p535_p9 = scmp.lt.u32.totalorder %s529_s25, %s139_s22 }
  0xaf   :  { %p534_p8 = por %p533_p7, %p532_p6 }
  0xb1   :  { %p536_p10 = por %p535_p9, %p534_p8 }
  0xb3   :  { %p537_p11 = pnand %p536_p10, %p530_p5 }
  0xb5   :  { %540 = shalt.err (!%p537_p11)  }
  0xb6   :  { %s541_s20 = scalar_lea.vmem %s784_s6, 32  ;;  %p546_p13 = scmp.lt.s32.totalorder %s784_s6, %s659_s21 }
  0xb7   :  { %p542_p12 = scmp.ne.s32.totalorder %s784_s6, %s541_s20  ;;  %p547_p0 = scmp.lt.s32.totalorder %s686_s16, %s541_s20 }
  0xb9   :  { %p548_p1 = por %p547_p0, %p546_p13 }
  0xbb   :  { %p549_p2 = pnand %p548_p1, %p542_p12 }
  0xbd   :  { %552 = shalt.err (!%p549_p2)  }
  0xbe   :  { %146 = dma.hbm_to_vmem [thread:$0]  %s139_s22, 32, %s784_s6, [#allocation3 + $0x6], %s623_s17, %s624_s18, %s625_s19 }
  0xbf   :  { %s150_s27 = sadd.s32 %s330_s24, %s148_s8 }
  0xc0   :  { %s352_s29 = sshll.u32 %s150_s27, 4 }
  0xc1   :  { %s353_s28 = sadd.s32 896, %s352_s29 }
  0xc2   :  { %s154_s10 = scalar_lea.hbm %s829_s1, %s353_s28 }
  0xc3   :  { %s553_s11 = scalar_lea.hbm %s154_s10, 32  ;;  %p556_p4 = scmp.lt.u32.totalorder %s154_s10, %s829_s1 }
  0xc4   :  { %p554_p3 = scmp.ne.s32.totalorder %s154_s10, %s553_s11  ;;  %p557_p5 = scmp.lt.u32.totalorder %s677_s12, %s553_s11 }
  0xc5   :  { %p559_p7 = scmp.lt.u32.totalorder %s553_s11, %s154_s10 }
  0xc6   :  { %p558_p6 = por %p557_p5, %p556_p4 }
  0xc8   :  { %p560_p8 = por %p559_p7, %p558_p6 }
  0xca   :  { %p561_p9 = pnand %p560_p8, %p554_p3 }
  0xcc   :  { %564 = shalt.err (!%p561_p9)  }
  0xcd   :  { %s565_s6 = scalar_lea.vmem %s159_s30, 32  ;;  %p570_p11 = scmp.lt.s32.totalorder %s159_s30, %s659_s21 }
  0xce   :  { %p566_p10 = scmp.ne.s32.totalorder %s159_s30, %s565_s6  ;;  %p571_p12 = scmp.lt.s32.totalorder %s686_s16, %s565_s6 }
  0xd0   :  { %p572_p13 = por %p571_p12, %p570_p11 }
  0xd2   :  { %p573_p0 = pnand %p572_p13, %p566_p10 }
  0xd4   :  { %576 = shalt.err (!%p573_p0)  }
  0xd5   :  { %161 = dma.hbm_to_vmem [thread:$0]  %s154_s10, 32, %s159_s30, [#allocation3 + $0x7], %s623_s17, %s624_s18, %s625_s19 }
  0xd6   :  { %601 = dma.done.wait [#allocation3], 32 }
  0xd7   :  { %602 = vsyncadd [#allocation3], 4294967264 }
  0xd8   :  { %603 = dma.done.wait [#allocation3 + $0x1], 32 }
  0xd9   :  { %604 = vsyncadd [#allocation3 + $0x1], 4294967264 }
  0xda   :  { %605 = dma.done.wait [#allocation3 + $0x2], 32 }
  0xdb   :  { %606 = vsyncadd [#allocation3 + $0x2], 4294967264 }
  0xdc   :  { %607 = dma.done.wait [#allocation3 + $0x3], 32 }
  0xdd   :  { %608 = vsyncadd [#allocation3 + $0x3], 4294967264 }
  0xde   :  { %609 = dma.done.wait [#allocation3 + $0x4], 32 }
  0xdf   :  { %610 = vsyncadd [#allocation3 + $0x4], 4294967264 }
  0xe0   :  { %611 = dma.done.wait [#allocation3 + $0x5], 32 }
  0xe1   :  { %612 = vsyncadd [#allocation3 + $0x5], 4294967264 }
  0xe2   :  { %613 = dma.done.wait [#allocation3 + $0x6], 32 }
  0xe3   :  { %614 = vsyncadd [#allocation3 + $0x6], 4294967264 }
  0xe4   :  { %615 = dma.done.wait [#allocation3 + $0x7], 32 }
  0xe5   :  { %616 = vsyncadd [#allocation3 + $0x7], 4294967264  ;;  %v178_v0 = vld [vmem:[#allocation2] sm:$0xff]  ;;  %v179_v1 = vld [vmem:[#allocation2 + $0x8] sm:$0xff]  ;;  %s631_s1 = smov [#allocation6]  }
  0xe6   :  { %v180_v2 = vsub.f32 0.0, %v178_v0  ;;  %v181_v3 = vsub.f32 0.0, %v179_v1  ;;  %s198_s21 = sshll.u32 %s631_s1, 4  ;;  %s199_s21 = int_to_ptr.vmem [resolvable:$true] %s198_s21 }
  0xe7   :  { %s577_s12 = scalar_lea.vmem %s199_s21, 256  ;;  %p582_p2 = scmp.lt.s32.totalorder %s199_s21, %s199_s21 }
  0xe8   :  { %v182_v4 = vmul.f32 1.442695, %v180_v2  ;;  %v184_v5 = vmul.f32 1.442695, %v181_v3  ;;  %p578_p1 = scmp.ne.s32.totalorder %s199_s21, %s577_s12  ;;  %p583_p3 = scmp.lt.s32.totalorder %s577_s12, %s577_s12 }
  0xea   :  { %367 = vpow2.f32 %v182_v4  ;;  %p584_p4 = por %p583_p3, %p582_p2 }
  0xeb   :  { %369 = vpow2.f32 %v184_v5 }
  0xec   :  { %p585_p5 = pnand %p584_p4, %p578_p1 }
  0xf4   :  { %v368_v6 = vpop.eup %367 }
  0xf5   :  { %v370_v7 = vpop.eup %369  ;;  %v186_v8 = vadd.f32 1.0, %v368_v6 }
  0xf6   :  { %v187_v9 = vadd.f32 1.0, %v370_v7 }
  0xf7   :  { %371 = vrcp.f32 %v186_v8 }
  0xf8   :  { %373 = vrcp.f32 %v187_v9 }
 0x101   :  { %v372_v10 = vpop.eup %371 }
 0x102   :  { %v374_v11 = vpop.eup %373  ;;  %190 = vst [vmem:[#allocation6] sm:$0xff] %v372_v10 }
 0x103   :  { %191 = vst [vmem:[#allocation6 + $0x8] sm:$0xff] %v374_v11 }
 0x104   :  { %588 = shalt.err (!%p585_p5)
}
 0x105   :  { %s589_s18 = scalar_lea.hbm %s830_s2, 256 }
 0x106   :  { %p590_p6 = scmp.ne.s32.totalorder %s830_s2, %s589_s18  ;;  %p593_p7 = scmp.lt.u32.totalorder %s589_s18, %s830_s2 }
 0x108   :  { %p595_p8 = pnand %p593_p7, %p590_p6 }
 0x10a   :  { %598 = shalt.err (!%p595_p8)
}
 0x10b   :  { %201 = dma.vmem_to_hbm [thread:$0]  %s199_s21, 256, %s830_s2, [#allocation7]  }
 0x10c   :  { %617 = dma.done.wait [#allocation7], 256  }
 0x10d   :  { %618 = vsyncadd [#allocation7], 4294967040 }
 0x10e   :  { %205 = vsyncpa [#allocation7], 1 }
 0x10f   :  { %206 = vsyncmov [#allocation3] }
 0x112   :  { %s207_s7 = vpop.sfrf %206 }
 0x113   :  { %p332_p9 = scmp.ne.s32.totalorder %s207_s7, 0 }
 0x115   :  { %211 = shalt.err (%p332_p9)  }
 0x116   :  { %213 = vsyncmov [#allocation3 + $0x1] }
 0x119   :  { %s214_s14 = vpop.sfrf %213 }
 0x11a   :  { %p333_p10 = scmp.ne.s32.totalorder %s214_s14, 0 }
 0x11c   :  { %218 = shalt.err (%p333_p10)  }
 0x11d   :  { %220 = vsyncmov [#allocation3 + $0x2] }
 0x120   :  { %s221_s22 = vpop.sfrf %220 }
 0x121   :  { %p334_p11 = scmp.ne.s32.totalorder %s221_s22, 0 }
 0x123   :  { %225 = shalt.err (%p334_p11)  }
 0x124   :  { %227 = vsyncmov [#allocation3 + $0x3] }
 0x127   :  { %s228_s24 = vpop.sfrf %227 }
 0x128   :  { %p335_p12 = scmp.ne.s32.totalorder %s228_s24, 0 }
 0x12a   :  { %232 = shalt.err (%p335_p12)  }
 0x12b   :  { %234 = vsyncmov [#allocation3 + $0x4] }
 0x12e   :  { %s235_s2 = vpop.sfrf %234 }
 0x12f   :  { %p336_p13 = scmp.ne.s32.totalorder %s235_s2, 0 }
 0x131   :  { %239 = shalt.err (%p336_p13)  }
 0x132   :  { %241 = vsyncmov [#allocation3 + $0x5] }
 0x135   :  { %s242_s25 = vpop.sfrf %241 }
 0x136   :  { %p337_p0 = scmp.ne.s32.totalorder %s242_s25, 0 }
 0x138   :  { %246 = shalt.err (%p337_p0)  }
 0x139   :  { %248 = vsyncmov [#allocation3 + $0x6] }
 0x13c   :  { %s249_s15 = vpop.sfrf %248 }
 0x13d   :  { %p338_p1 = scmp.ne.s32.totalorder %s249_s15, 0 }
 0x13f   :  { %253 = shalt.err (%p338_p1)  }
 0x140   :  { %255 = vsyncmov [#allocation3 + $0x7] }
 0x143   :  { %s256_s26 = vpop.sfrf %255 }
 0x144   :  { %p339_p2 = scmp.ne.s32.totalorder %s256_s26, 0 }
 0x146   :  { %260 = shalt.err (%p339_p2)  }

</bundles_post_ra>
